<compile_context>
chip_gen: v6e
topology: v6e:2x2x1
jax: 0.10.0
libtpu: 0.0.40
codegen_flags: <defaults>
</compile_context>

<pallas_src>
import functools

import jax
import jax.numpy as jnp
from jax.experimental import pallas as pl
from jax.experimental.pallas import tpu as pltpu

_LANE = 128


def _round_up(x, m):
    return (x + m - 1) // m * m


def _vmem_capacity_bytes():
    """Per-TensorCore VMEM capacity; conservative 64 MiB if query fails."""
    try:
        info = pltpu.get_tpu_info()
        cap = getattr(info, "vmem_capacity_bytes", None)
        if cap:
            return int(cap)
    except Exception:
        pass
    return 64 * 1024 * 1024


_VMEM_CAP = _vmem_capacity_bytes()
# Fused (all-resident) path: budget ~70% of VMEM, scoped limit ~85%.
_FUSED_VMEM_BUDGET = int(0.70 * _VMEM_CAP)
_FUSED_VMEM_LIMIT = int(0.85 * _VMEM_CAP)
# K-tiled path scoped limit: ~96 MiB on v5e/v6e, ~48 MiB on v7x.
_TILED_VMEM_LIMIT = int(0.75 * _VMEM_CAP)


def _sigmoid_f32(x):
    """Sigmoid in f32; exp and approx reciprocal both run on the EUP slot."""
    denom = 1.0 + jnp.exp(-x)
    # approx reciprocal can overshoot by ~2^-12 when denom ~ 1; clamp to keep
    # outputs inside the sigmoid's [0, 1] range.
    return jnp.clip(pl.reciprocal(denom, approx=True), 0.0, 1.0)


# ------------------------- Fused whole-head kernel -------------------------- #

def _fused_head_kernel(*refs, n_layers: int):
    """refs = (x_ref, w0, b0, ..., w{L-1}, b{L-1}, o_ref); all VMEM-resident.

    x_ref: (M, K) bf16; w_i: (K_i, N_i) bf16 (input-major); b_i: (1, N_i) f32.
    Intermediates never leave vregs; only the final lane-dense tile is stored.
    """
    x_ref = refs[0]
    o_ref = refs[-1]
    x = x_ref[...]                               # already bf16 (cast in wrapper)
    for i in range(n_layers):
        w_ref = refs[1 + 2 * i]
        b_ref = refs[2 + 2 * i]
        acc = jnp.dot(x, w_ref[...], preferred_element_type=jnp.float32)
        acc = acc + b_ref[...]                   # f32 epilogue (broadcast (1,N))
        if i == n_layers - 1:
            o_ref[...] = _sigmoid_f32(acc).astype(o_ref.dtype)
        else:
            x = acc.astype(jnp.bfloat16)         # next layer's MXU input


def _fused_head(x_bf16, layers):
    """x_bf16: (M, K) bf16; layers: [(w_t bf16 (K_i, N_i), b f32 (N_i,)), ...]."""
    M = x_bf16.shape[0]
    n_layers = len(layers)
    n_out = layers[-1][0].shape[1]

    operands = [x_bf16]
    flops = 0
    hbm_bytes = x_bf16.size * 2
    k_in = x_bf16.shape[1]
    for w_t, b in layers:
        operands += [w_t, b.reshape(1, -1)]
        flops += 2 * M * k_in * w_t.shape[1]
        hbm_bytes += w_t.size * 2 + b.size * 4
        k_in = w_t.shape[1]
    hbm_bytes += M * n_out * 4                   # final f32 store

    kernel = functools.partial(_fused_head_kernel, n_layers=n_layers)
    return pl.pallas_call(
        kernel,
        out_shape=jax.ShapeDtypeStruct((M, n_out), jnp.float32),
        in_specs=[pl.BlockSpec(memory_space=pltpu.MemorySpace.VMEM)] * len(operands),
        out_specs=pl.BlockSpec(memory_space=pltpu.MemorySpace.VMEM),
        cost_estimate=pl.CostEstimate(
            flops=flops,
            transcendentals=2 * M * n_out,       # exp + reciprocal per output
            bytes_accessed=hbm_bytes),
        compiler_params=pltpu.CompilerParams(
            vmem_limit_bytes=_FUSED_VMEM_LIMIT),
    )(*operands)


# --------------- K-tiled whole-head kernel (large d_feature) ---------------- #

def _ktiled_head_kernel(*refs, n_tail: int, use_scratch: bool):
    """First layer K-tiled over the grid; tail layers + sigmoid in the epilogue.

    refs = (x_blk, w1_blk, b1, tail_w0, tail_b0, ..., o_ref[, acc_scratch]).
    If there is no tail, the output ref itself is the f32 accumulator.
    """
    x_ref, w1_ref, b1_ref = refs[0], refs[1], refs[2]
    tail_refs = refs[3:3 + 2 * n_tail]
    o_ref = refs[3 + 2 * n_tail]
    acc_ref = refs[3 + 2 * n_tail + 1] if use_scratch else o_ref

    k = pl.program_id(0)

    @pl.when(k == 0)
    def _():
        acc_ref[...] = jnp.zeros_like(acc_ref)

    acc_ref[...] += jnp.dot(x_ref[...], w1_ref[...],
                            preferred_element_type=jnp.float32)

    @pl.when(k == pl.num_programs(0) - 1)
    def _():
        h = acc_ref[...] + b1_ref[...]
        for i in range(n_tail):
            w_ref = tail_refs[2 * i]
            b_ref = tail_refs[2 * i + 1]
            h = jnp.dot(h.astype(jnp.bfloat16), w_ref[...],
                        preferred_element_type=jnp.float32) + b_ref[...]
        o_ref[...] = _sigmoid_f32(h).astype(o_ref.dtype)


def _pick_tk(K, N1, M, resident_bytes, vmem_limit, max_tk=None):
    """Largest lane-aligned divisor of K whose double-buffered blocks fit."""
    budget = vmem_limit - resident_bytes - (4 << 20)     # Mosaic scratch margin
    per_unit = 2 * (M * 2 + N1 * 2)       # 2 pipeline bufs x (x + W1) bf16 per K col
    cap = max(budget // max(per_unit, 1), _LANE)
    if max_tk is not None:
        cap = min(cap, max_tk)
    cap = min(cap, K)
    cap = max((cap // _LANE) * _LANE, _LANE)
    q = K // _LANE
    for d in range(cap // _LANE, 0, -1):
        if q % d == 0:
            return d * _LANE
    return _LANE


def _ktiled_head(x_bf16, layers, *, max_tk=None):
    M, K = x_bf16.shape
    w1_t, b1 = layers[0]
    N1 = w1_t.shape[1]
    tail = layers[1:]
    n_tail = len(tail)
    n_out = layers[-1][0].shape[1]
    use_scratch = n_tail > 0

    # VMEM-resident bytes (output, bias, tail params, hidden accumulator).
    resident = M * n_out * 4 + b1.size * 4
    if use_scratch:
        resident += M * N1 * 4
    for w_t, b in tail:
        resident += w_t.size * 2 + b.size * 4

    tk = _pick_tk(K, N1, M, resident, _TILED_VMEM_LIMIT, max_tk=max_tk)
    grid = (K // tk,)

    in_specs = [
        pl.BlockSpec((M, tk), lambda k: (0, k)),          # x block (bf16)
        pl.BlockSpec((tk, N1), lambda k: (k, 0)),         # W1 block (bf16)
        pl.BlockSpec((1, N1), lambda k: (0, 0)),          # b1 (resident)
    ]
    operands = [x_bf16, w1_t, b1.reshape(1, -1)]
    flops = 2 * M * K * N1
    hbm_bytes = x_bf16.size * 2 + w1_t.size * 2 + b1.size * 4
    k_in = N1
    for w_t, b in tail:                                   # small tail: resident
        n = w_t.shape[1]
        in_specs += [
            pl.BlockSpec(w_t.shape, lambda k: (0, 0)),
            pl.BlockSpec((1, n), lambda k: (0, 0)),
        ]
        operands += [w_t, b.reshape(1, -1)]
        flops += 2 * M * k_in * n
        hbm_bytes += w_t.size * 2 + b.size * 4
        k_in = n
    hbm_bytes += M * n_out * 4

    scratch_shapes = []
    if use_scratch:
        scratch_shapes.append(pltpu.VMEM((M, N1), jnp.float32))

    kernel = functools.partial(_ktiled_head_kernel, n_tail=n_tail,
                               use_scratch=use_scratch)
    return pl.pallas_call(
        kernel,
        out_shape=jax.ShapeDtypeStruct((M, n_out), jnp.float32),
        grid_spec=pltpu.PrefetchScalarGridSpec(
            num_scalar_prefetch=0,
            grid=grid,
            in_specs=in_specs,
            out_specs=pl.BlockSpec((M, n_out), lambda k: (0, 0)),
            scratch_shapes=scratch_shapes,
        ),
        cost_estimate=pl.CostEstimate(
            flops=flops,
            transcendentals=2 * M * n_out,
            bytes_accessed=hbm_bytes),
        compiler_params=pltpu.CompilerParams(
            dimension_semantics=("arbitrary",),
            vmem_limit_bytes=_TILED_VMEM_LIMIT),
    )(*operands)


# --------------------------- Parameter creation ----------------------------- #

def _trunc_normal(key, shape, std=0.02, a=-2.0, b=2.0):
    # nn.init.trunc_normal_(std=0.02) truncates at ABSOLUTE a=-2, b=2 (i.e.
    # +-100 sigma for std=0.02) -> effectively an untruncated N(0, std).
    lo, hi = a / std, b / std
    return jax.random.truncated_normal(key, lo, hi, shape, jnp.float32) * std


def init_label_cls_head_params(key, d_feature, d_hidden, n_labels,
                               weight_dtype=jnp.bfloat16):
    """Synthetic weights mirroring LabelCLSHead._init_weight.

    Weights stored bf16, input-major (K, N); every dimension (d_feature, all
    hidden dims, classifier output) is zero-padded to a multiple of 128 so
    all MXU passes and the final HBM store are lane-dense.
    """
    dims_true = list(d_hidden) + [n_labels]
    layers = []
    in_true = d_feature
    in_pad = _round_up(d_feature, _LANE)
    for out_true in dims_true:
        out_pad = _round_up(out_true, _LANE)
        key, wk = jax.random.split(key)
        w = _trunc_normal(wk, (out_true, in_true))          # PyTorch (out, in)
        w_t = jnp.transpose(w)                              # (in, out)
        w_t = jnp.pad(w_t, ((0, in_pad - in_true), (0, out_pad - out_true)))
        b = jnp.zeros((out_pad,), jnp.float32)              # f32 bias
        layers.append((w_t.astype(weight_dtype), b))
        in_true, in_pad = out_true, out_pad
    return {"layers": layers, "n_labels": n_labels,
            "d_feature": d_feature,
            "d_feature_padded": _round_up(d_feature, _LANE)}


# ------------------------------ Forward pass -------------------------------- #

def label_cls_head_forward(emb, params, dropout_p=0.0, *,
                           force_tiled=False, max_tk=None):
    """emb: (batch, n_channels, n_segs, d_model) -> (batch, n_labels)."""
    layers = params["layers"]
    n_labels = params["n_labels"]
    B = emb.shape[0]
    x = emb.reshape(B, -1)                                  # nn.Flatten(start_dim=1)
    K_pad = params["d_feature_padded"]
    if K_pad > x.shape[1]:
        x = jnp.pad(x, ((0, 0), (0, K_pad - x.shape[1])))   # zero cols match W pad
    x = x.astype(jnp.bfloat16)                              # cast once in wrapper

    # Dropout sits between the hidden stack and the classifier; identity at
    # inference (eval mode), so nothing is emitted.
    # TODO(synk): training-mode dropout (pltpu.prng_* Bernoulli mask) not implemented.

    # Estimate fused-path VMEM need (operands + f32 activations/output), with
    # a 25% margin for Mosaic internal scratch and cast temporaries.
    n_out = layers[-1][0].shape[1]
    vmem_est = x.size * 2 + B * n_out * 4
    for w_t, b in layers:
        vmem_est += w_t.size * 2 + b.size * 4 + B * w_t.shape[1] * 4
    vmem_est = int(vmem_est * 1.25)

    if force_tiled or vmem_est > _FUSED_VMEM_BUDGET:
        y = _ktiled_head(x, layers, max_tk=max_tk)          # single launch, K-tiled W1
    else:
        y = _fused_head(x, layers)                          # single launch, all resident
    return y[:, :n_labels]


def _reference_forward(emb, params):
    """Pure-JAX reference with the same bf16 weights (exact sigmoid)."""
    B = emb.shape[0]
    x = emb.reshape(B, -1)
    K_pad = params["d_feature_padded"]
    if K_pad > x.shape[1]:
        x = jnp.pad(x, ((0, 0), (0, K_pad - x.shape[1])))
    x = x.astype(jnp.bfloat16)
    layers = params["layers"]
    h = None
    for i, (w_t, b) in enumerate(layers):
        h = jnp.dot(x, w_t, preferred_element_type=jnp.float32) + b.reshape(1, -1)
        if i < len(layers) - 1:
            x = h.astype(jnp.bfloat16)
    y = jax.nn.sigmoid(h)
    return y[:, :params["n_labels"]]


# ---------------------------------- Main ------------------------------------ #

if __name__ == "__main__":
    # Small shapes consistent with the module's forward signature.
    batch, n_channels, n_segs, d_model = 2, 4, 8, 32
    d_feature = n_channels * n_segs * d_model               # 1024
    d_hidden = [128, 64]
    n_labels = 6
    dropout = 0.1                                            # identity at inference

    key = jax.random.PRNGKey(0)
    key, ek = jax.random.split(key)
    emb = jax.random.normal(ek, (batch, n_channels, n_segs, d_model),
                            dtype=jnp.float32)
    params = init_label_cls_head_params(key, d_feature, d_hidden, n_labels)

    # Fused (single-launch, all-VMEM-resident) path.
    y_fused = jax.block_until_ready(
        label_cls_head_forward(emb, params, dropout_p=dropout))
    # K-tiled path, forced with small tk (4 K-steps) to exercise the
    # large-d_feature code path on the same problem.
    y_tiled = jax.block_until_ready(
        label_cls_head_forward(emb, params, dropout_p=dropout,
                               force_tiled=True, max_tk=256))

    y_ref = _reference_forward(emb, params)

    assert y_fused.shape == (batch, n_labels)
    assert y_tiled.shape == (batch, n_labels)
    assert bool(jnp.all((y_fused >= 0.0) & (y_fused <= 1.0)))
    assert bool(jnp.all(jnp.abs(y_fused - y_ref) < 2e-3))
    assert bool(jnp.all(jnp.abs(y_tiled - y_ref) < 2e-3))
    print("KERNEL_OK")
</pallas_src>

<mosaic_0001>
module attributes {stable_mosaic.version = 11 : i64} {
  func.func @_fused_head_kernel(%arg0: memref<2x1024xbf16, #tpu.memory_space<vmem>>, %arg1: memref<1024x128xbf16, #tpu.memory_space<vmem>>, %arg2: memref<1x128xf32, #tpu.memory_space<vmem>>, %arg3: memref<128x128xbf16, #tpu.memory_space<vmem>>, %arg4: memref<1x128xf32, #tpu.memory_space<vmem>>, %arg5: memref<128x128xbf16, #tpu.memory_space<vmem>>, %arg6: memref<1x128xf32, #tpu.memory_space<vmem>>, %arg7: memref<2x128xf32, #tpu.memory_space<vmem>>) attributes {dimension_semantics = [], scalar_prefetch = 0 : i64, scratch_operands = 0 : i64, tpu.core_type = #tpu.core_type<tc>} {
    %c0 = arith.constant 0 : index
    %c0_0 = arith.constant 0 : index
    %0 = vector.load %arg0[%c0, %c0_0] : memref<2x1024xbf16, #tpu.memory_space<vmem>>, vector<2x1024xbf16>
    %c0_1 = arith.constant 0 : index
    %c0_2 = arith.constant 0 : index
    %1 = vector.load %arg1[%c0_1, %c0_2] : memref<1024x128xbf16, #tpu.memory_space<vmem>>, vector<1024x128xbf16>
    %cst = arith.constant dense<0.000000e+00> : vector<2x128xf32>
    %2 = tpu.matmul %0, %1, %cst {dimension_numbers = #tpu.dot_dimension_numbers<[1], [0], [0], [1], [0, 0, 1, 1], [], []>} : vector<2x1024xbf16>, vector<1024x128xbf16>, vector<2x128xf32> -> vector<2x128xf32>
    %c0_3 = arith.constant 0 : index
    %c0_4 = arith.constant 0 : index
    %3 = vector.load %arg2[%c0_3, %c0_4] : memref<1x128xf32, #tpu.memory_space<vmem>>, vector<1x128xf32>
    %4 = vector.broadcast %3 : vector<1x128xf32> to vector<2x128xf32>
    %5 = arith.addf %2, %4 : vector<2x128xf32>
    %6 = arith.truncf %5 : vector<2x128xf32> to vector<2x128xbf16>
    %c0_5 = arith.constant 0 : index
    %c0_6 = arith.constant 0 : index
    %7 = vector.load %arg3[%c0_5, %c0_6] : memref<128x128xbf16, #tpu.memory_space<vmem>>, vector<128x128xbf16>
    %cst_7 = arith.constant dense<0.000000e+00> : vector<2x128xf32>
    %8 = tpu.matmul %6, %7, %cst_7 {dimension_numbers = #tpu.dot_dimension_numbers<[1], [0], [0], [1], [0, 0, 1, 1], [], []>} : vector<2x128xbf16>, vector<128x128xbf16>, vector<2x128xf32> -> vector<2x128xf32>
    %c0_8 = arith.constant 0 : index
    %c0_9 = arith.constant 0 : index
    %9 = vector.load %arg4[%c0_8, %c0_9] : memref<1x128xf32, #tpu.memory_space<vmem>>, vector<1x128xf32>
    %10 = vector.broadcast %9 : vector<1x128xf32> to vector<2x128xf32>
    %11 = arith.addf %8, %10 : vector<2x128xf32>
    %12 = arith.truncf %11 : vector<2x128xf32> to vector<2x128xbf16>
    %c0_10 = arith.constant 0 : index
    %c0_11 = arith.constant 0 : index
    %13 = vector.load %arg5[%c0_10, %c0_11] : memref<128x128xbf16, #tpu.memory_space<vmem>>, vector<128x128xbf16>
    %cst_12 = arith.constant dense<0.000000e+00> : vector<2x128xf32>
    %14 = tpu.matmul %12, %13, %cst_12 {dimension_numbers = #tpu.dot_dimension_numbers<[1], [0], [0], [1], [0, 0, 1, 1], [], []>} : vector<2x128xbf16>, vector<128x128xbf16>, vector<2x128xf32> -> vector<2x128xf32>
    %c0_13 = arith.constant 0 : index
    %c0_14 = arith.constant 0 : index
    %15 = vector.load %arg6[%c0_13, %c0_14] : memref<1x128xf32, #tpu.memory_space<vmem>>, vector<1x128xf32>
    %16 = vector.broadcast %15 : vector<1x128xf32> to vector<2x128xf32>
    %17 = arith.addf %14, %16 : vector<2x128xf32>
    %cst_15 = arith.constant 0.000000e+00 : f32
    %18 = vector.broadcast %cst_15 : f32 to vector<2x128xf32>
    %19 = arith.subf %18, %17 : vector<2x128xf32>
    %20 = math.exp %19 : vector<2x128xf32>
    %cst_16 = arith.constant 1.000000e+00 : f32
    %21 = vector.broadcast %cst_16 : f32 to vector<2x128xf32>
    %22 = arith.addf %21, %20 : vector<2x128xf32>
    %23 = tpu.reciprocal %22 {approx = true} : vector<2x128xf32> -> vector<2x128xf32>
    %cst_17 = arith.constant 0.000000e+00 : f32
    %cst_18 = arith.constant 1.000000e+00 : f32
    %24 = vector.broadcast %cst_17 : f32 to vector<2x128xf32>
    %25 = arith.maximumf %24, %23 : vector<2x128xf32>
    %26 = vector.broadcast %cst_18 : f32 to vector<2x128xf32>
    %27 = arith.minimumf %26, %25 : vector<2x128xf32>
    %c0_19 = arith.constant 0 : index
    %c0_20 = arith.constant 0 : index
    %28 = vector.load %arg7[%c0_19, %c0_20] : memref<2x128xf32, #tpu.memory_space<vmem>>, vector<2x128xf32>
    tpu.vector_store %arg7[%c0_19, %c0_20], %27 {strides = array<i32>} : memref<2x128xf32, #tpu.memory_space<vmem>>, vector<2x128xf32>,
    return
  }
}

</mosaic_0001>

<bundles_post_ra>
// kernel: tpu_custom_call.1
= control target key start
LH: loop header
LB: loop body
LE: loop exit
PB: predicated region body
PF: predicated region fallthrough
CT: control target
= control target key end

     0   :  { %12 = vsyncpa [#allocation3], 0  ;;  %s1596_s0 = inlined_call_operand.hbm [shape: bf16[2,1024], index: 0, kind: input, shape index: {}]   ;;  %s1597_s1 = inlined_call_operand.hbm [shape: bf16[1024,128], index: 1, kind: input, shape index: {}]   ;;  %s1598_s2 = inlined_call_operand.vmem [shape: f32[1,128], index: 2, kind: input, shape index: {}]   ;;  %s1599_s3 = inlined_call_operand.hbm [shape: bf16[128,128], index: 3, kind: input, shape index: {}]   ;;  %s1600_s4 = inlined_call_operand.vmem [shape: f32[1,128], index: 4, kind: input, shape index: {}]   ;;  %s1601_s5 = inlined_call_operand.hbm [shape: bf16[128,128], index: 5, kind: input, shape index: {}]   ;;  %s1602_s6 = inlined_call_operand.vmem [shape: f32[1,128], index: 6, kind: input, shape index: {}]   ;;  %s1603_s7 = inlined_call_operand.hbm [shape: f32[2,128], index: 7, kind: output, shape index: {}]  }
   0x1   :  { %13 = vsyncpa [#allocation6], 0 }
   0x2   :  { %14 = vsyncpa [#allocation9], 0 }
   0x3   :  { %15 = vsyncpa [#allocation4], 0  ;;  %s1500_s24 = smov [#allocation5]  }
   0x4   :  { %s31_s25 = sshll.u32 %s1500_s24, 4  ;;  %s32_s25 = int_to_ptr.vmem [resolvable:$true] %s31_s25 }
   0x5   :  { %s1400_s26 = scalar_lea.vmem %s32_s25, 8192  ;;  %p1405_p1 = scmp.lt.s32.totalorder %s32_s25, %s32_s25 }
   0x6   :  { %p1401_p0 = scmp.ne.s32.totalorder %s32_s25, %s1400_s26  ;;  %p1406_p2 = scmp.lt.s32.totalorder %s1400_s26, %s1400_s26 }
   0x8   :  { %p1407_p3 = por %p1406_p2, %p1405_p1 }
   0xa   :  { %p1408_p4 = pnand %p1407_p3, %p1401_p0 }
   0xc   :  { %1411 = shalt.err (!%p1408_p4)
}
   0xd   :  { %s1501_s27 = smov 64   ;;  %s1502_s28 = smov 4  }
   0xe   :  { %37 = dma.hbm_to_vmem [thread:$0]  %s1597_s1, 8192, %s32_s25, [#allocation6], %s1501_s27, %s1501_s27, %s1502_s28  }
   0xf   :  { %s1503_s8 = smov [#allocation2]   ;;  %s1504_s10 = smov [#allocation7]  }
  0x10   :  { %s22_s9 = sshll.u32 %s1503_s8, 4  ;;  %s45_s11 = sshll.u32 %s1504_s10, 4  ;;  %s23_s9 = int_to_ptr.vmem [resolvable:$true] %s22_s9  ;;  %s46_s11 = int_to_ptr.vmem [resolvable:$true] %s45_s11 }
  0x11   :  { %s1420_s12 = scalar_lea.vmem %s23_s9, 128  ;;  %p1425_p6 = scmp.lt.s32.totalorder %s23_s9, %s23_s9 }
  0x12   :  { %p1421_p5 = scmp.ne.s32.totalorder %s23_s9, %s1420_s12  ;;  %p1426_p7 = scmp.lt.s32.totalorder %s1420_s12, %s1420_s12 }
  0x14   :  { %p1427_p8 = por %p1426_p7, %p1425_p6 }
  0x16   :  { %p1428_p9 = pnand %p1427_p8, %p1421_p5 }
  0x18   :  { %1431 = shalt.err (!%p1428_p9)
}
  0x19   :  { %25 = dma.hbm_to_vmem [thread:$0]  %s1596_s0, 128, %s23_s9, [#allocation3]  }
  0x1a   :  { %s1440_s15 = scalar_lea.vmem %s46_s11, 1024  ;;  %p1445_p11 = scmp.lt.s32.totalorder %s46_s11, %s46_s11 }
  0x1b   :  { %p1441_p10 = scmp.ne.s32.totalorder %s46_s11, %s1440_s15  ;;  %p1446_p12 = scmp.lt.s32.totalorder %s1440_s15, %s1440_s15 }
  0x1d   :  { %p1447_p13 = por %p1446_p12, %p1445_p11 }
  0x1f   :  { %p1448_p0 = pnand %p1447_p13, %p1441_p10 }
  0x21   :  { %1451 = shalt.err (!%p1448_p0)
}
  0x22   :  { %51 = dma.hbm_to_vmem [thread:$0]  %s1599_s3, 1024, %s46_s11, [#allocation6], %s1501_s27, %s1501_s27, %s1502_s28  }
  0x23   :  { %s1505_s17 = smov [#allocation8]  }
  0x24   :  { %s59_s18 = sshll.u32 %s1505_s17, 4  ;;  %s60_s18 = int_to_ptr.vmem [resolvable:$true] %s59_s18 }
  0x25   :  { %s1460_s19 = scalar_lea.vmem %s60_s18, 1024  ;;  %p1465_p2 = scmp.lt.s32.totalorder %s60_s18, %s60_s18 }
  0x26   :  { %p1461_p1 = scmp.ne.s32.totalorder %s60_s18, %s1460_s19  ;;  %p1466_p3 = scmp.lt.s32.totalorder %s1460_s19, %s1460_s19 }
  0x28   :  { %p1467_p4 = por %p1466_p3, %p1465_p2 }
  0x2a   :  { %p1468_p5 = pnand %p1467_p4, %p1461_p1 }
  0x2c   :  { %1471 = shalt.err (!%p1468_p5)
}
  0x2d   :  { %65 = dma.hbm_to_vmem [thread:$0]  %s1601_s5, 1024, %s60_s18, [#allocation9], %s1501_s27, %s1501_s27, %s1502_s28  }
  0x2e   :  { %1492 = dma.done.wait [#allocation3], 128  }
  0x2f   :  { %1493 = vsyncadd [#allocation3], 4294967168 }
  0x30   :  { %1494 = dma.done.wait [#allocation6], 9216  }
  0x31   :  { %1495 = vsyncadd [#allocation6], 4294958080 }
  0x32   :  { %1496 = dma.done.wait [#allocation9], 1024  }
  0x33   :  { %1497 = vsyncadd [#allocation9], 4294966272  ;;  %v1307_v0 = vld [vmem:[#allocation5 + $0x78] sm:$0xff]   ;;  %v1311_v4 = vld [vmem:[#allocation5 + $0x70] sm:$0xff]   ;;  %v1506_v22 = vmov 1966171168   ;;  %v222_v24 = vlaneseq }
  0x34   :  { %v1308_v1 = vld [vmem:[#allocation5 + $0xf8] sm:$0xff]   ;;  %1151 = vmatprep.subr.bf16.mxu0 %v1307_v0  ;;  %v1312_v5 = vld [vmem:[#allocation5 + $0xf0] sm:$0xff]   ;;  %v1315_v8 = vld [vmem:[#allocation5 + $0x68] sm:$0xff]   ;;  %v220_v23 = vunpack.c.l.s4 %v1506_v22  ;;  %vm1508_vm0 = vmmov 0  }
  0x35   :  { %v1309_v2 = vld [vmem:[#allocation5 + $0x38] sm:$0xff]   ;;  %1173 = vmatprep.subr.bf16.mxu1 %v1308_v1  ;;  %v1313_v6 = vld [vmem:[#allocation5 + $0x30] sm:$0xff]   ;;  %v1316_v9 = vld [vmem:[#allocation5 + $0xe8] sm:$0xff]   ;;  %v223_v30 = vshrl.u32 %v222_v24, 7 }
  0x36   :  { %v1310_v3 = vld [vmem:[#allocation5 + $0xb8] sm:$0xff]   ;;  %1152 = vmatpush3.bf16.msra.mxu0 %v1309_v2  ;;  %v1314_v7 = vld [vmem:[#allocation5 + $0xb0] sm:$0xff]   ;;  %v1317_v10 = vld [vmem:[#allocation5 + $0x28] sm:$0xff]   ;;  %v221_v29 = vunpack.c.0.s8 %v220_v23 }
  0x37   :  { %1174 = vmatpush3.bf16.msra.mxu1 %v1310_v3  ;;  %1153 = vmatprep.subr.bf16.mxu0 %v1311_v4  ;;  %v1318_v11 = vld [vmem:[#allocation5 + $0xa8] sm:$0xff]   ;;  %v1319_v12 = vld [vmem:[#allocation5 + $0x60] sm:$0xff]   ;;  %v1323_v16 = vld [vmem:[#allocation5 + $0x58] sm:$0xff]  }
  0x38   :  { %1175 = vmatprep.subr.bf16.mxu1 %v1312_v5  ;;  %v1320_v13 = vld [vmem:[#allocation5 + $0xe0] sm:$0xff]   ;;  %v1324_v17 = vld [vmem:[#allocation5 + $0xd8] sm:$0xff]   ;;  %v1327_v20 = vld [vmem:[#allocation5 + $0x50] sm:$0xff]   ;;  %v1571_v35 = vsub.s32 %v221_v29, %v223_v30 }
  0x39   :  { %v1321_v14 = vld [vmem:[#allocation5 + $0x20] sm:$0xff]   ;;  %v1325_v18 = vld [vmem:[#allocation5 + $0x18] sm:$0xff]   ;;  %v1328_v21 = vld [vmem:[#allocation5 + $0xd0] sm:$0xff]  }
  0x3a   :  { %1154 = vmatpush3.bf16.msra.mxu0 %v1313_v6  ;;  %v1322_v15 = vld [vmem:[#allocation5 + $0xa0] sm:$0xff]   ;;  %v1326_v19 = vld [vmem:[#allocation5 + $0x98] sm:$0xff]   ;;  %v1329_v25 = vld [vmem:[#allocation5 + $0x10] sm:$0xff]  }
  0x3b   :  { %1176 = vmatpush3.bf16.msra.mxu1 %v1314_v7  ;;  %1155 = vmatprep.subr.bf16.mxu0 %v1315_v8  ;;  %v1330_v26 = vld [vmem:[#allocation5 + $0x90] sm:$0xff]   ;;  %v1331_v27 = vld [vmem:[#allocation5 + $0x48] sm:$0xff]   ;;  %v1335_v33 = vld [vmem:[#allocation5 + $0x40] sm:$0xff]  }
  0x3c   :  { %1177 = vmatprep.subr.bf16.mxu1 %v1316_v9  ;;  %v1332_v28 = vld [vmem:[#allocation5 + $0xc8] sm:$0xff]   ;;  %v1336_v34 = vld [vmem:[#allocation5 + $0xc0] sm:$0xff]   ;;  %v81_v38 = vld [vmem:[#allocation2] sm:$0xff] }
  0x3d   :  { %v1333_v31 = vld [vmem:[#allocation5 + $0x8] sm:$0xff]   ;;  %v1337_v36 = vld [vmem:[#allocation5] sm:$0xff]   ;;  %v218_v39 = vcombine.high %v81_v38, %v81_v38  ;;  %v225_v40 = vrot.slane %v81_v38, %v1571_v35  ;;  %v1340_v41 = vld [vmem:[#allocation5 + $0x178] sm:$0xff]  }
  0x3e   :  { %1156 = vmatpush3.bf16.msra.mxu0 %v1317_v10  ;;  %v1334_v32 = vld [vmem:[#allocation5 + $0x88] sm:$0xff]   ;;  %v1338_v37 = vld [vmem:[#allocation5 + $0x80] sm:$0xff]   ;;  %v1341_v42 = vld [vmem:[#allocation5 + $0x1f8] sm:$0xff]  }
  0x3f   :  { %1178 = vmatpush3.bf16.msra.mxu1 %v1318_v11  ;;  %1157 = vmatprep.subr.bf16.mxu0 %v1319_v12  ;;  %v233_v43 = vcombine.high %v225_v40, %v225_v40  ;;  %v241_v44 = vrot.slane %v225_v40, %v1571_v35  ;;  %v1576_v45 = vrot.slane %v218_v39, %v1571_v35  ;;  %v1342_v46 = vld [vmem:[#allocation5 + $0x138] sm:$0xff]   ;;  %v1344_v51 = vld [vmem:[#allocation5 + $0x170] sm:$0xff]   ;;  %v1348_v58 = vld [vmem:[#allocation5 + $0x168] sm:$0xff]  }
  0x40   :  { %1179 = vmatprep.subr.bf16.mxu1 %v1320_v13  ;;  %v1343_v48 = vld [vmem:[#allocation5 + $0x1b8] sm:$0xff]   ;;  %v1345_v53 = vld [vmem:[#allocation5 + $0x1f0] sm:$0xff]   ;;  %v1349_v59 = vld [vmem:[#allocation5 + $0x1e8] sm:$0xff]  }
  0x41   :  { %v255_v47 = vrot.slane %v233_v43, %v1571_v35  ;;  %v234_v49 = vcombine.high %v1576_v45, %v1576_v45  ;;  %v263_v50 = vcombine.high %v241_v44, %v241_v44  ;;  %v1346_v55 = vld [vmem:[#allocation5 + $0x130] sm:$0xff]   ;;  %v1350_v60 = vld [vmem:[#allocation5 + $0x128] sm:$0xff]   ;;  %v1352_v62 = vld [vmem:[#allocation5 + $0x160] sm:$0xff]  }
  0x42   :  { %1158 = vmatpush3.bf16.msra.mxu0 %v1321_v14  ;;  %v1347_v56 = vld [vmem:[#allocation5 + $0x1b0] sm:$0xff]   ;;  %v1351_v61 = vld [vmem:[#allocation5 + $0x1a8] sm:$0xff]   ;;  %v1353_v63 = vld [vmem:[#allocation5 + $0x1e0] sm:$0xff]  }
  0x43   :  { %1180 = vmatpush3.bf16.msra.mxu1 %v1322_v15  ;;  %1159 = vmatprep.subr.bf16.mxu0 %v1323_v16  ;;  %v265_v52 = vcombine.high %v255_v47, %v255_v47  ;;  %v262_v54 = vrot.slane %v234_v49, %v1571_v35  ;;  %v1354_v0 = vld [vmem:[#allocation5 + $0x120] sm:$0xff]   ;;  %v1356_v2 = vld [vmem:[#allocation5 + $0x158] sm:$0xff]   ;;  %v1360_v6 = vld [vmem:[#allocation5 + $0x150] sm:$0xff]  }
  0x44   :  { %1181 = vmatprep.subr.bf16.mxu1 %v1324_v17  ;;  %691 = vmatprep.mubr.bf16.mxu0 %v255_v47  ;;  %v1355_v1 = vld [vmem:[#allocation5 + $0x1a0] sm:$0xff]   ;;  %v1357_v3 = vld [vmem:[#allocation5 + $0x1d8] sm:$0xff]   ;;  %v1361_v7 = vld [vmem:[#allocation5 + $0x1d0] sm:$0xff]  }
  0x45   :  { %731 = vmatprep.mubr.bf16.mxu1 %v265_v52  ;;  %v266_v57 = vcombine.high %v262_v54, %v262_v54  ;;  %v1358_v4 = vld [vmem:[#allocation5 + $0x118] sm:$0xff]   ;;  %v1362_v8 = vld [vmem:[#allocation5 + $0x110] sm:$0xff]   ;;  %v1364_v10 = vld [vmem:[#allocation5 + $0x148] sm:$0xff]  }
  0x46   :  { %1160 = vmatpush3.bf16.msra.mxu0 %v1325_v18  ;;  %v1359_v5 = vld [vmem:[#allocation5 + $0x198] sm:$0xff]   ;;  %v1363_v9 = vld [vmem:[#allocation5 + $0x190] sm:$0xff]   ;;  %v1365_v11 = vld [vmem:[#allocation5 + $0x1c8] sm:$0xff]   ;;  %v248_v18 = vrot.slane %v1576_v45, %v1571_v35 }
  0x47   :  { %1182 = vmatpush3.bf16.msra.mxu1 %v1326_v19  ;;  %1161 = vmatprep.subr.bf16.mxu0 %v1327_v20  ;;  %v1366_v12 = vld [vmem:[#allocation5 + $0x108] sm:$0xff]   ;;  %v1368_v14 = vld [vmem:[#allocation5 + $0x140] sm:$0xff]   ;;  %v1372_v20 = vld [vmem:[#allocation7 + $0x38] sm:$0xff]  }
  0x48   :  { %1183 = vmatprep.subr.bf16.mxu1 %v1328_v21  ;;  %v1367_v13 = vld [vmem:[#allocation5 + $0x188] sm:$0xff]   ;;  %v1369_v15 = vld [vmem:[#allocation5 + $0x1c0] sm:$0xff]   ;;  %v264_v19 = vcombine.high %v248_v18, %v248_v18  ;;  %v1507_v21 = vmov 0.0   ;;  %v1373_v22 = vld [vmem:[#allocation7 + $0x30] sm:$0xff]  }
  0x49   :  { %v1370_v16 = vld [vmem:[#allocation5 + $0x100] sm:$0xff]   ;;  %v1374_v23 = vld [vmem:[#allocation7 + $0x28] sm:$0xff]   ;;  %v1380_v29 = vld [vmem:[#allocation8 + $0x38] sm:$0xff]  }
  0x4a   :  { %1162 = vmatpush3.bf16.msra.mxu0 %v1329_v25  ;;  %v1371_v17 = vld [vmem:[#allocation5 + $0x180] sm:$0xff]   ;;  %v1376_v25 = vld [vmem:[#allocation7 + $0x18] sm:$0xff]   ;;  %v1381_v30 = vld [vmem:[#allocation8 + $0x30] sm:$0xff]  }
  0x4b   :  { %1184 = vmatpush3.bf16.msra.mxu1 %v1330_v26  ;;  %1163 = vmatprep.subr.bf16.mxu0 %v1331_v27  ;;  %v1375_v24 = vld [vmem:[#allocation7 + $0x20] sm:$0xff]   ;;  %v1377_v26 = vld [vmem:[#allocation7 + $0x10] sm:$0xff]   ;;  %v1378_v27 = vld [vmem:[#allocation7 + $0x8] sm:$0xff]  }
  0x4c   :  { %1185 = vmatprep.subr.bf16.mxu1 %v1332_v28  ;;  %v1379_v28 = vld [vmem:[#allocation7] sm:$0xff]   ;;  %v1386_v35 = vld [vmem:[#allocation8 + $0x8] sm:$0xff]   ;;  %v1068_v45 = vld [vmem:[%s1598_s2] ss:$0 sm:$0xff] }
  0x4e   :  { %1164 = vmatpush3.bf16.msra.mxu0 %v1333_v31  ;;  %v1382_v31 = vld [vmem:[#allocation8 + $0x28] sm:$0xff]  }
  0x4f   :  { %1186 = vmatpush3.bf16.msra.mxu1 %v1334_v32  ;;  %1165 = vmatprep.subr.bf16.mxu0 %v1335_v33  ;;  %v1383_v32 = vld [vmem:[#allocation8 + $0x20] sm:$0xff]   ;;  %v1384_v33 = vld [vmem:[#allocation8 + $0x18] sm:$0xff]  }
  0x50   :  { %1187 = vmatprep.subr.bf16.mxu1 %v1336_v34  ;;  %v1385_v34 = vld [vmem:[#allocation8 + $0x10] sm:$0xff]  }
  0x52   :  { %1166 = vmatpush3.bf16.msra.mxu0 %v1337_v36 }
  0x53   :  { %1188 = vmatpush3.bf16.msra.mxu1 %v1338_v37  ;;  %1195 = vmatprep.subr.bf16.mxu0 %v1340_v41 }
  0x54   :  { %1217 = vmatprep.subr.bf16.mxu1 %v1341_v42 }
  0x55   :  { %692 = vmatmul.mubr.bf16.vlgmr.msra.gmra.mxu0 %v241_v44 }
  0x56   :  { %1196 = vmatpush3.bf16.msra.mxu0 %v1342_v46  ;;  %732 = vmatmul.mubr.bf16.vlgmr.msra.gmra.mxu1 %v263_v50 }
  0x57   :  { %1197 = vmatprep.subr.bf16.mxu0 %v1344_v51  ;;  %1218 = vmatpush3.bf16.msra.mxu1 %v1343_v48 }
  0x58   :  { %771 = vmatprep.mubr.bf16.mxu0 %v262_v54  ;;  %1219 = vmatprep.subr.bf16.mxu1 %v1345_v53 }
  0x59   :  { %811 = vmatprep.mubr.bf16.mxu1 %v266_v57 }
  0x5a   :  { %1198 = vmatpush3.bf16.msra.mxu0 %v1346_v55 }
  0x5b   :  { %1199 = vmatprep.subr.bf16.mxu0 %v1348_v58  ;;  %1220 = vmatpush3.bf16.msra.mxu1 %v1347_v56 }
  0x5c   :  { %1221 = vmatprep.subr.bf16.mxu1 %v1349_v59 }
  0x5e   :  { %1200 = vmatpush3.bf16.msra.mxu0 %v1350_v60 }
  0x5f   :  { %1201 = vmatprep.subr.bf16.mxu0 %v1352_v62  ;;  %1222 = vmatpush3.bf16.msra.mxu1 %v1351_v61  ;;  %v1387_v62 = vld [vmem:[#allocation8] sm:$0xff]  }
  0x60   :  { %1223 = vmatprep.subr.bf16.mxu1 %v1353_v63  ;;  %v1133_v63 = vld [vmem:[%s1600_s4] ss:$0 sm:$0xff]  ;;  %s1509_s4 = smov [#allocation10]  }
  0x61   :  { %s1057_s24 = sshll.u32 %s1509_s4, 4  ;;  %s1058_s24 = int_to_ptr.vmem [resolvable:$true] %s1057_s24 }
  0x62   :  { %1202 = vmatpush3.bf16.msra.mxu0 %v1354_v0  ;;  %s1472_s25 = scalar_lea.vmem %s1058_s24, 32  ;;  %p1477_p7 = scmp.lt.s32.totalorder %s1058_s24, %s1058_s24 }
  0x63   :  { %1203 = vmatprep.subr.bf16.mxu0 %v1356_v2  ;;  %1224 = vmatpush3.bf16.msra.mxu1 %v1355_v1  ;;  %p1473_p6 = scmp.ne.s32.totalorder %s1058_s24, %s1472_s25  ;;  %p1478_p8 = scmp.lt.s32.totalorder %s1472_s25, %s1472_s25 }
  0x64   :  { %1225 = vmatprep.subr.bf16.mxu1 %v1357_v3 }
  0x65   :  { %p1479_p9 = por %p1478_p8, %p1477_p7 }
  0x66   :  { %1204 = vmatpush3.bf16.msra.mxu0 %v1358_v4 }
  0x67   :  { %1205 = vmatprep.subr.bf16.mxu0 %v1360_v6  ;;  %1226 = vmatpush3.bf16.msra.mxu1 %v1359_v5  ;;  %v1142_v6 = vld [vmem:[%s1602_s6] ss:$0 sm:$0xff]  ;;  %p1480_p10 = pnand %p1479_p9, %p1473_p6 }
  0x68   :  { %1227 = vmatprep.subr.bf16.mxu1 %v1361_v7 }
  0x6a   :  { %1206 = vmatpush3.bf16.msra.mxu0 %v1362_v8 }
  0x6b   :  { %1207 = vmatprep.subr.bf16.mxu0 %v1364_v10  ;;  %1228 = vmatpush3.bf16.msra.mxu1 %v1363_v9 }
  0x6c   :  { %1229 = vmatprep.subr.bf16.mxu1 %v1365_v11 }
  0x6e   :  { %1208 = vmatpush3.bf16.msra.mxu0 %v1366_v12 }
  0x6f   :  { %1209 = vmatprep.subr.bf16.mxu0 %v1368_v14  ;;  %1230 = vmatpush3.bf16.msra.mxu1 %v1367_v13 }
  0x70   :  { %1231 = vmatprep.subr.bf16.mxu1 %v1369_v15 }
  0x72   :  { %1210 = vmatpush3.bf16.msra.mxu0 %v1370_v16 }
  0x73   :  { %1232 = vmatpush3.bf16.msra.mxu1 %v1371_v17  ;;  %1257 = vmatprep.subr.bf16.mxu0 %v1507_v21 }
  0x74   :  { %1277 = vmatprep.subr.bf16.mxu1 %v1507_v21 }
  0x75   :  { %772 = vmatmul.mubr.bf16.vlgmr.msra.gmra.mxu0 %v248_v18 }
  0x76   :  { %812 = vmatmul.mubr.bf16.vlgmr.msra.gmra.mxu1 %v264_v19  ;;  %1258 = vmatpush3.bf16.msra.mxu0 %v1372_v20 }
  0x77   :  { %1259 = vmatprep.subr.bf16.mxu0 %v1507_v21  ;;  %1273 = vmatprep.mubr.msk.bf16.mxu0 %vm1508_vm0, %v1507_v21 }
  0x78   :  { %1293 = vmatprep.mubr.msk.bf16.mxu1 %vm1508_vm0, %v1507_v21  ;;  %1278 = vmatpush3.bf16.msra.mxu1 %v1380_v29 }
  0x79   :  { %1279 = vmatprep.subr.bf16.mxu1 %v1507_v21 }
  0x7a   :  { %1260 = vmatpush3.bf16.msra.mxu0 %v1373_v22 }
  0x7b   :  { %1261 = vmatprep.subr.bf16.mxu0 %v1507_v21 }
  0x7c   :  { %1280 = vmatpush3.bf16.msra.mxu1 %v1381_v30 }
  0x7d   :  { %1281 = vmatprep.subr.bf16.mxu1 %v1507_v21 }
  0x7e   :  { %1262 = vmatpush3.bf16.msra.mxu0 %v1374_v23 }
  0x7f   :  { %1263 = vmatprep.subr.bf16.mxu0 %v1507_v21 }
  0x80   :  { %1282 = vmatpush3.bf16.msra.mxu1 %v1382_v31 }
  0x81   :  { %1283 = vmatprep.subr.bf16.mxu1 %v1507_v21 }
  0x82   :  { %1264 = vmatpush3.bf16.msra.mxu0 %v1375_v24 }
  0x83   :  { %1265 = vmatprep.subr.bf16.mxu0 %v1507_v21 }
  0x84   :  { %1284 = vmatpush3.bf16.msra.mxu1 %v1383_v32 }
  0x85   :  { %1285 = vmatprep.subr.bf16.mxu1 %v1507_v21 }
  0x86   :  { %1266 = vmatpush3.bf16.msra.mxu0 %v1376_v25 }
  0x87   :  { %1267 = vmatprep.subr.bf16.mxu0 %v1507_v21 }
  0x88   :  { %1286 = vmatpush3.bf16.msra.mxu1 %v1384_v33 }
  0x89   :  { %1287 = vmatprep.subr.bf16.mxu1 %v1507_v21 }
  0x8a   :  { %1268 = vmatpush3.bf16.msra.mxu0 %v1377_v26 }
  0x8b   :  { %1269 = vmatprep.subr.bf16.mxu0 %v1507_v21 }
  0x8c   :  { %1288 = vmatpush3.bf16.msra.mxu1 %v1385_v34 }
  0x8d   :  { %1289 = vmatprep.subr.bf16.mxu1 %v1507_v21 }
  0x8e   :  { %1270 = vmatpush3.bf16.msra.mxu0 %v1378_v27 }
  0x8f   :  { %1271 = vmatprep.subr.bf16.mxu0 %v1507_v21 }
  0x90   :  { %1290 = vmatpush3.bf16.msra.mxu1 %v1386_v35 }
  0x91   :  { %1291 = vmatprep.subr.bf16.mxu1 %v1507_v21 }
  0x92   :  { %1272 = vmatpush3.bf16.msra.mxu0 %v1379_v28 }
  0x94   :  { %1292 = vmatpush3.bf16.msra.mxu1 %v1387_v62 }
 0x115   :  { %v1167_v36 = vpop.f32.mrf.mxu0 }
 0x116   :  { %v1189_v37 = vpop.f32.mrf.mxu1 }
 0x117   :  { %v1168_v38 = vpop.f32.mrf.mxu0 }
 0x118   :  { %v1190_v39 = vpop.f32.mrf.mxu1  ;;  %v1169_v44 = vadd.f32 %v1168_v38, %v1167_v36 }
 0x119   :  { %v1170_v40 = vpop.f32.mrf.mxu0  ;;  %v1191_v47 = vadd.f32 %v1190_v39, %v1189_v37 }
 0x11a   :  { %v1192_v41 = vpop.f32.mrf.mxu1  ;;  %v694_v46 = vadd.f32 %v1169_v44, %v1068_v45 }
 0x11b   :  { %v1171_v42 = vpop.f32.mrf.mxu0 }
 0x11c   :  { %v1193_v43 = vpop.f32.mrf.mxu1  ;;  %v734_v51 = vadd.f32 %v1191_v47, %v694_v46 }
 0x135   :  { %v1211_v48 = vpop.f32.mrf.mxu0 }
 0x136   :  { %v1233_v49 = vpop.f32.mrf.mxu1 }
 0x137   :  { %v1212_v50 = vpop.f32.mrf.mxu0 }
 0x138   :  { %v1213_v52 = vadd.f32 %v1212_v50, %v1211_v48  ;;  %v1234_v53 = vpop.f32.mrf.mxu1 }
 0x139   :  { %v1214_v54 = vpop.f32.mrf.mxu0  ;;  %v1235_v56 = vadd.f32 %v1234_v53, %v1233_v49 }
 0x13a   :  { %v774_v55 = vadd.f32 %v1213_v52, %v734_v51  ;;  %v1236_v57 = vpop.f32.mrf.mxu1 }
 0x13b   :  { %v1215_v58 = vpop.f32.mrf.mxu0 }
 0x13c   :  { %v814_v59 = vadd.f32 %v1235_v56, %v774_v55  ;;  %v1237_v60 = vpop.f32.mrf.mxu1 }
 0x13e   :  { %v819_v61 = vpack.c.bf16 %v814_v59, %v814_v59 }
 0x140   :  { %1274 = vmatmul.mubr.bf16.vlgmr.msra.gmra.mxu0 %v819_v61 }
 0x200   :  { %v925_v0 = vpop.f32.mrf.mxu0 }
 0x201   :  { %v926_v1 = vadd.f32 %v1133_v63, %v925_v0 }
 0x202   :  { %v1275_v2 = vpop.f32.mrf.mxu0 }
 0x203   :  { %v931_v3 = vpack.c.bf16 %v926_v1, %v926_v1 }
 0x204   :  { %v928_v4 = vpop.f32.mrf.mxu0 }
 0x205   :  { %1294 = vmatmul.mubr.bf16.vlgmr.msra.gmra.mxu1 %v931_v3 }
 0x206   :  { %v1276_v5 = vpop.f32.mrf.mxu0 }
 0x2c5   :  { %v1037_v7 = vpop.f32.mrf.mxu1 }
 0x2c6   :  { %v1038_v8 = vadd.f32 %v1142_v6, %v1037_v7 }
 0x2c7   :  { %v1295_v9 = vpop.f32.mrf.mxu1 }
 0x2c8   :  { %v1043_v10 = vsub.f32 0.0, %v1038_v8 }
 0x2c9   :  { %v1040_v11 = vpop.f32.mrf.mxu1 }
 0x2ca   :  { %v1044_v12 = vmul.f32 1.442695, %v1043_v10 }
 0x2cb   :  { %v1296_v13 = vpop.f32.mrf.mxu1 }
 0x2cc   :  { %1388 = vpow2.f32 %v1044_v12 }
 0x2d9   :  { %v1389_v14 = vpop.eup %1388 }
 0x2da   :  { %v1046_v15 = vadd.f32 1.0, %v1389_v14 }
 0x2dc   :  { %1390 = vrcp.f32 %v1046_v15 }
 0x2e9   :  { %v1391_v16 = vpop.eup %1390 }
 0x2ea   :  { %v1048_v17 = vmax.f32 %v1391_v16, 0.0 }
 0x2ec   :  { %v1049_v18 = vmin.f32 %v1048_v17, 1.0 }
 0x2ee   :  { %1050 = vst [vmem:[#allocation10] sm:$0x3] %v1049_v18 }
 0x2ef   :  { %1483 = shalt.err (!%p1480_p10)
}
 0x2f0   :  { %1060 = dma.vmem_to_hbm [thread:$0]  %s1058_s24, 32, %s1603_s7, [#allocation4]  }
 0x2f1   :  { %1498 = dma.done.wait [#allocation4], 32  }
 0x2f2   :  { %1499 = vsyncadd [#allocation4], 4294967264 }
 0x2f3   :  { %1064 = vsyncpa [#allocation3], 1 }
 0x2f4   :  { %1065 = vsyncpa [#allocation6], 1 }
 0x2f5   :  { %1066 = vsyncpa [#allocation9], 1 }
 0x2f6   :  { %1067 = vsyncpa [#allocation4], 1 }

</bundles_post_ra>
